<compile_context>
chip_gen: v5e
topology: v5e:2x2
jax: 0.10.0
libtpu: 0.0.40
codegen_flags: <defaults>
</compile_context>

<pallas_src>
import jax
import jax.numpy as jnp
import numpy as np
from jax.experimental import pallas as pl
from jax.experimental.pallas import tpu as pltpu


def fuzzy_att_kernel(x_ref, mu_ref, isig2_ref, w1_ref, bn_s_ref, bn_b_ref,
                     w2_ref, b2_ref, out_ref):
    # Static shapes (known at trace time).
    _, R, HW = x_ref.shape            # R = Bt * C packed rows
    m = mu_ref.shape[1]
    C, P = w2_ref.shape
    Bt = R // C
    inv_hw = 1.0 / HW

    x = x_ref[0]                      # (R, HW) f32
    mu = mu_ref[...]                  # (R, m)   per-row (= per channel) mu
    isig2 = isig2_ref[...]            # (R, m)   per-row 1/sigma^2 (hoisted)

    # ---- fuzzy membership + spatial mean, looped over the m fuzzy sets -----
    # No (m, R, HW) intermediate: only one (R, HW) stream is live per step.
    pooled = []                       # m tensors of shape (R, 1)
    for i in range(m):
        d = x - mu[:, i:i + 1]                              # (R, HW)
        e = jnp.exp(-(d * d) * isig2[:, i:i + 1])           # (R, HW)
        pooled.append(jnp.sum(e, axis=-1, keepdims=True) * inv_hw)

    bn_s = bn_s_ref[...]              # (1, P) folded BN scale
    bn_b = bn_b_ref[...]              # (1, P) folded BN bias
    w2 = w2_ref[...]                  # (C, P)
    b2 = b2_ref[...]                  # (C, 1)

    # ---- tiny feedforward per packed sample (all VPU, no MXU) --------------
    att_rows = []
    for bt in range(Bt):
        r0 = bt * C
        # conv1 (1x1, no bias): h[p] = sum_{i,c} w1[p, i, c] * g[i, c]
        h = jnp.zeros((1, P), jnp.float32)
        for i in range(m):
            w1_i = w1_ref[i]                                # (C, P)
            g_i = pooled[i][r0:r0 + C, :]                   # (C, 1)
            h = h + jnp.sum(w1_i * g_i, axis=0, keepdims=True)   # (1, P)
        # BatchNorm (eval mode, folded) + SiLU
        h = h * bn_s + bn_b
        h = h * jax.nn.sigmoid(h)
        # conv2 (1x1, bias) + sigmoid; broadcast-mul + lane reduce
        z = jnp.sum(w2 * h, axis=1, keepdims=True) + b2     # (C, 1)
        att_rows.append(jax.nn.sigmoid(z) + 1.0)            # residual folded

    att_p1 = jnp.concatenate(att_rows, axis=0)              # (R, 1)

    # ---- fused residual channel re-weighting: x * (att + 1) ----------------
    out_ref[0] = x * att_p1


def _pick_batch_tile(B, C):
    """Pick Bt so packed Bt*C rows fill the 8 f32 sublanes when possible."""
    want = max(1, 8 // max(C, 1))
    for bt in range(min(want, B), 0, -1):
        if B % bt == 0 and (bt * C) % 8 == 0:
            return bt
    for bt in range(min(want, B), 0, -1):
        if B % bt == 0:
            return bt
    return 1


def fuzzy_channel_att(x, mu, sigma, w1, bn_scale, bn_bias, w2, b2):
    """x: (B, C, H, W) f32 (NCHW). mu/sigma: (m, C). w1: (P, m, C).
    bn_scale/bn_bias: (P,) eval-mode-folded BN. w2: (C, P). b2: (C,)."""
    B, C, H, W = x.shape
    HW = H * W
    m = mu.shape[0]
    P = w1.shape[0]

    Bt = _pick_batch_tile(B, C)
    G = B // Bt
    R = Bt * C

    # (B, C, H, W) -> (G, Bt*C, HW): pure reshape of the contiguous NCHW data.
    x2 = x.reshape(G, R, HW)

    # Hoisted reciprocal: kernel multiplies by 1/sigma^2 instead of dividing.
    inv_sig2 = 1.0 / (sigma * sigma)                        # (m, C)
    # Tile per-channel params to the packed row layout (row = bt*C + c).
    mu_p = jnp.tile(mu.T, (Bt, 1))                          # (R, m)
    isig2_p = jnp.tile(inv_sig2.T, (Bt, 1))                 # (R, m)
    # conv1 weight (P, m, C) -> (m, C, P): lets the kernel slice per fuzzy set
    # and keep P on the lane axis for the (1, P) hidden vector.
    w1_r = jnp.transpose(w1, (1, 2, 0))                     # (m, C, P)
    bn_s = bn_scale.reshape(1, P)
    bn_b = bn_bias.reshape(1, P)
    b2c = b2.reshape(C, 1)

    out = pl.pallas_call(
        fuzzy_att_kernel,
        out_shape=jax.ShapeDtypeStruct((G, R, HW), x.dtype),
        grid_spec=pltpu.PrefetchScalarGridSpec(
            num_scalar_prefetch=0,
            grid=(G,),
            in_specs=[
                pl.BlockSpec((1, R, HW), lambda b: (b, 0, 0)),   # x (packed)
                pl.BlockSpec((R, m), lambda b: (0, 0)),          # mu (packed)
                pl.BlockSpec((R, m), lambda b: (0, 0)),          # 1/sigma^2
                pl.BlockSpec((m, C, P), lambda b: (0, 0, 0)),    # conv1 weight
                pl.BlockSpec((1, P), lambda b: (0, 0)),          # bn scale
                pl.BlockSpec((1, P), lambda b: (0, 0)),          # bn bias
                pl.BlockSpec((C, P), lambda b: (0, 0)),          # conv2 weight
                pl.BlockSpec((C, 1), lambda b: (0, 0)),          # conv2 bias
            ],
            out_specs=pl.BlockSpec((1, R, HW), lambda b: (b, 0, 0)),
        ),
        compiler_params=pltpu.CompilerParams(
            dimension_semantics=("parallel",)),
    )(x2, mu_p, isig2_p, w1_r, bn_s, bn_b, w2, b2c)
    return out.reshape(B, C, H, W)


def reference(x, mu, sigma, w1, bn_scale, bn_bias, w2, b2):
    """Pure-JAX reference of the PyTorch forward (eval-mode BN)."""
    B, C, H, W = x.shape
    m = mu.shape[0]
    P = w1.shape[0]
    d = (x[:, None] - mu[None, :, :, None, None]) / sigma[None, :, :, None, None]
    g = jnp.exp(-(d * d)).mean(axis=(3, 4))                 # (B, m, C)
    gf = g.reshape(B, m * C)
    w1f = w1.reshape(P, m * C)
    h = jnp.einsum("bk,pk->bp", gf, w1f,
                   precision=jax.lax.Precision.HIGHEST)     # (B, P)
    h = h * bn_scale[None, :] + bn_bias[None, :]
    h = h * jax.nn.sigmoid(h)
    z = jnp.einsum("bp,cp->bc", h, w2,
                   precision=jax.lax.Precision.HIGHEST) + b2[None, :]
    att = jax.nn.sigmoid(z)
    return att[:, :, None, None] * x + x


if __name__ == "__main__":
    # Small shapes consistent with the module.
    B, C, H, W = 2, 4, 16, 16
    m, squeeze = 4, 4
    plane = m * C            # 16
    P = plane // squeeze     # 4

    key = jax.random.PRNGKey(0)
    ks = jax.random.split(key, 6)

    x = jax.random.normal(ks[0], (B, C, H, W), jnp.float32)

    # Module parameters (deterministic synthetic init, shapes from __init__).
    mu = jax.random.normal(ks[1], (m, C), jnp.float32)       # (m, C, 1, 1)
    sigma = jax.random.normal(ks[2], (m, C), jnp.float32)    # (m, C, 1, 1)
    # Conv2d(plane, plane//squeeze, 1, bias=False): weight (P, m*C, 1, 1),
    # stored here reshaped to (P, m, C) (m-major, c-minor flattening).
    w1 = jax.random.normal(ks[3], (P, m, C), jnp.float32) * 0.1
    # BatchNorm2d(P) default init, eval mode -> folded scale/bias.
    eps = 1e-5
    gamma = jnp.ones((P,), jnp.float32)
    beta = jnp.zeros((P,), jnp.float32)
    run_mean = jnp.zeros((P,), jnp.float32)
    run_var = jnp.ones((P,), jnp.float32)
    bn_scale = gamma / jnp.sqrt(run_var + eps)
    bn_bias = beta - run_mean * bn_scale
    # Conv2d(P, C, 1) with bias: weight (C, P, 1, 1), bias (C,).
    w2 = jax.random.normal(ks[4], (C, P), jnp.float32) * 0.1
    b2 = jax.random.normal(ks[5], (C,), jnp.float32) * 0.1

    out = jax.block_until_ready(
        fuzzy_channel_att(x, mu, sigma, w1, bn_scale, bn_bias, w2, b2))
    ref = jax.block_until_ready(
        reference(x, mu, sigma, w1, bn_scale, bn_bias, w2, b2))

    np.testing.assert_allclose(np.asarray(out), np.asarray(ref),
                               rtol=1e-5, atol=1e-5)
    print("KERNEL_OK")
</pallas_src>

<mosaic_0001>
module attributes {stable_mosaic.version = 11 : i64} {
  func.func @fuzzy_att_kernel(%arg0: i32, %arg1: memref<1x8x256xf32, #tpu.memory_space<vmem>>, %arg2: memref<8x4xf32, #tpu.memory_space<vmem>>, %arg3: memref<8x4xf32, #tpu.memory_space<vmem>>, %arg4: memref<4x4x4xf32, #tpu.memory_space<vmem>>, %arg5: memref<1x4xf32, #tpu.memory_space<vmem>>, %arg6: memref<1x4xf32, #tpu.memory_space<vmem>>, %arg7: memref<4x4xf32, #tpu.memory_space<vmem>>, %arg8: memref<4x1xf32, #tpu.memory_space<vmem>>, %arg9: memref<1x8x256xf32, #tpu.memory_space<vmem>>) attributes {dimension_semantics = [#tpu.dimension_semantics<parallel>], iteration_bounds = array<i64: 1>, scalar_prefetch = 0 : i64, scratch_operands = 0 : i64, tpu.core_type = #tpu.core_type<tc>, window_params = [{transform_indices = @transform_0, window_bounds = array<i64: 1, 8, 256>}, {pipeline_mode = #tpu.pipeline_mode<synchronous>, transform_indices = @transform_1, window_bounds = array<i64: 8, 4>}, {pipeline_mode = #tpu.pipeline_mode<synchronous>, transform_indices = @transform_2, window_bounds = array<i64: 8, 4>}, {pipeline_mode = #tpu.pipeline_mode<synchronous>, transform_indices = @transform_3, window_bounds = array<i64: 4, 4, 4>}, {pipeline_mode = #tpu.pipeline_mode<synchronous>, transform_indices = @transform_4, window_bounds = array<i64: 1, 4>}, {pipeline_mode = #tpu.pipeline_mode<synchronous>, transform_indices = @transform_5, window_bounds = array<i64: 1, 4>}, {pipeline_mode = #tpu.pipeline_mode<synchronous>, transform_indices = @transform_6, window_bounds = array<i64: 4, 4>}, {pipeline_mode = #tpu.pipeline_mode<synchronous>, transform_indices = @transform_7, window_bounds = array<i64: 4, 1>}, {transform_indices = @transform_8, window_bounds = array<i64: 1, 8, 256>}]} {
    %c0 = arith.constant 0 : index
    %c0_0 = arith.constant 0 : index
    %c0_1 = arith.constant 0 : index
    %0 = vector.load %arg1[%c0, %c0_0, %c0_1] : memref<1x8x256xf32, #tpu.memory_space<vmem>>, vector<1x8x256xf32>
    %1 = vector.shape_cast %0 : vector<1x8x256xf32> to vector<8x256xf32>
    %c0_2 = arith.constant 0 : index
    %c0_3 = arith.constant 0 : index
    %2 = vector.load %arg2[%c0_2, %c0_3] : memref<8x4xf32, #tpu.memory_space<vmem>>, vector<8x4xf32>
    %c0_4 = arith.constant 0 : index
    %c0_5 = arith.constant 0 : index
    %3 = vector.load %arg3[%c0_4, %c0_5] : memref<8x4xf32, #tpu.memory_space<vmem>>, vector<8x4xf32>
    %4 = vector.extract_strided_slice %2 {offsets = [0, 0], sizes = [8, 1], strides = [1, 1]} : vector<8x4xf32> to vector<8x1xf32>
    %5 = vector.broadcast %4 : vector<8x1xf32> to vector<8x256xf32>
    %6 = arith.subf %1, %5 : vector<8x256xf32>
    %7 = arith.mulf %6, %6 : vector<8x256xf32>
    %cst = arith.constant 0.000000e+00 : f32
    %8 = vector.broadcast %cst : f32 to vector<8x256xf32>
    %9 = arith.subf %8, %7 : vector<8x256xf32>
    %10 = vector.extract_strided_slice %3 {offsets = [0, 0], sizes = [8, 1], strides = [1, 1]} : vector<8x4xf32> to vector<8x1xf32>
    %11 = vector.broadcast %10 : vector<8x1xf32> to vector<8x256xf32>
    %12 = arith.mulf %9, %11 : vector<8x256xf32>
    %13 = math.exp %12 : vector<8x256xf32>
    %cst_6 = arith.constant dense<0.000000e+00> : vector<8xf32>
    %14 = vector.multi_reduction <add>, %13, %cst_6 [1] : vector<8x256xf32> to vector<8xf32>
    %15 = vector.shape_cast %14 : vector<8xf32> to vector<8x1xf32>
    %cst_7 = arith.constant 3.906250e-03 : f32
    %16 = vector.broadcast %cst_7 : f32 to vector<8x1xf32>
    %17 = arith.mulf %15, %16 : vector<8x1xf32>
    %18 = vector.extract_strided_slice %2 {offsets = [0, 1], sizes = [8, 1], strides = [1, 1]} : vector<8x4xf32> to vector<8x1xf32>
    %19 = vector.broadcast %18 : vector<8x1xf32> to vector<8x256xf32>
    %20 = arith.subf %1, %19 : vector<8x256xf32>
    %21 = arith.mulf %20, %20 : vector<8x256xf32>
    %cst_8 = arith.constant 0.000000e+00 : f32
    %22 = vector.broadcast %cst_8 : f32 to vector<8x256xf32>
    %23 = arith.subf %22, %21 : vector<8x256xf32>
    %24 = vector.extract_strided_slice %3 {offsets = [0, 1], sizes = [8, 1], strides = [1, 1]} : vector<8x4xf32> to vector<8x1xf32>
    %25 = vector.broadcast %24 : vector<8x1xf32> to vector<8x256xf32>
    %26 = arith.mulf %23, %25 : vector<8x256xf32>
    %27 = math.exp %26 : vector<8x256xf32>
    %cst_9 = arith.constant dense<0.000000e+00> : vector<8xf32>
    %28 = vector.multi_reduction <add>, %27, %cst_9 [1] : vector<8x256xf32> to vector<8xf32>
    %29 = vector.shape_cast %28 : vector<8xf32> to vector<8x1xf32>
    %cst_10 = arith.constant 3.906250e-03 : f32
    %30 = vector.broadcast %cst_10 : f32 to vector<8x1xf32>
    %31 = arith.mulf %29, %30 : vector<8x1xf32>
    %32 = vector.extract_strided_slice %2 {offsets = [0, 2], sizes = [8, 1], strides = [1, 1]} : vector<8x4xf32> to vector<8x1xf32>
    %33 = vector.broadcast %32 : vector<8x1xf32> to vector<8x256xf32>
    %34 = arith.subf %1, %33 : vector<8x256xf32>
    %35 = arith.mulf %34, %34 : vector<8x256xf32>
    %cst_11 = arith.constant 0.000000e+00 : f32
    %36 = vector.broadcast %cst_11 : f32 to vector<8x256xf32>
    %37 = arith.subf %36, %35 : vector<8x256xf32>
    %38 = vector.extract_strided_slice %3 {offsets = [0, 2], sizes = [8, 1], strides = [1, 1]} : vector<8x4xf32> to vector<8x1xf32>
    %39 = vector.broadcast %38 : vector<8x1xf32> to vector<8x256xf32>
    %40 = arith.mulf %37, %39 : vector<8x256xf32>
    %41 = math.exp %40 : vector<8x256xf32>
    %cst_12 = arith.constant dense<0.000000e+00> : vector<8xf32>
    %42 = vector.multi_reduction <add>, %41, %cst_12 [1] : vector<8x256xf32> to vector<8xf32>
    %43 = vector.shape_cast %42 : vector<8xf32> to vector<8x1xf32>
    %cst_13 = arith.constant 3.906250e-03 : f32
    %44 = vector.broadcast %cst_13 : f32 to vector<8x1xf32>
    %45 = arith.mulf %43, %44 : vector<8x1xf32>
    %46 = vector.extract_strided_slice %2 {offsets = [0, 3], sizes = [8, 1], strides = [1, 1]} : vector<8x4xf32> to vector<8x1xf32>
    %47 = vector.broadcast %46 : vector<8x1xf32> to vector<8x256xf32>
    %48 = arith.subf %1, %47 : vector<8x256xf32>
    %49 = arith.mulf %48, %48 : vector<8x256xf32>
    %cst_14 = arith.constant 0.000000e+00 : f32
    %50 = vector.broadcast %cst_14 : f32 to vector<8x256xf32>
    %51 = arith.subf %50, %49 : vector<8x256xf32>
    %52 = vector.extract_strided_slice %3 {offsets = [0, 3], sizes = [8, 1], strides = [1, 1]} : vector<8x4xf32> to vector<8x1xf32>
    %53 = vector.broadcast %52 : vector<8x1xf32> to vector<8x256xf32>
    %54 = arith.mulf %51, %53 : vector<8x256xf32>
    %55 = math.exp %54 : vector<8x256xf32>
    %cst_15 = arith.constant dense<0.000000e+00> : vector<8xf32>
    %56 = vector.multi_reduction <add>, %55, %cst_15 [1] : vector<8x256xf32> to vector<8xf32>
    %57 = vector.shape_cast %56 : vector<8xf32> to vector<8x1xf32>
    %cst_16 = arith.constant 3.906250e-03 : f32
    %58 = vector.broadcast %cst_16 : f32 to vector<8x1xf32>
    %59 = arith.mulf %57, %58 : vector<8x1xf32>
    %c0_17 = arith.constant 0 : index
    %c0_18 = arith.constant 0 : index
    %60 = vector.load %arg5[%c0_17, %c0_18] : memref<1x4xf32, #tpu.memory_space<vmem>>, vector<1x4xf32>
    %c0_19 = arith.constant 0 : index
    %c0_20 = arith.constant 0 : index
    %61 = vector.load %arg6[%c0_19, %c0_20] : memref<1x4xf32, #tpu.memory_space<vmem>>, vector<1x4xf32>
    %c0_21 = arith.constant 0 : index
    %c0_22 = arith.constant 0 : index
    %62 = vector.load %arg7[%c0_21, %c0_22] : memref<4x4xf32, #tpu.memory_space<vmem>>, vector<4x4xf32>
    %c0_23 = arith.constant 0 : index
    %c0_24 = arith.constant 0 : index
    %63 = vector.load %arg8[%c0_23, %c0_24] : memref<4x1xf32, #tpu.memory_space<vmem>>, vector<4x1xf32>
    %cst_25 = arith.constant 0.000000e+00 : f32
    %64 = vector.broadcast %cst_25 : f32 to vector<1x4xf32>
    %c0_26 = arith.constant 0 : index
    %c0_27 = arith.constant 0 : index
    %c0_28 = arith.constant 0 : index
    %65 = vector.load %arg4[%c0_26, %c0_27, %c0_28] : memref<4x4x4xf32, #tpu.memory_space<vmem>>, vector<1x4x4xf32>
    %66 = vector.shape_cast %65 : vector<1x4x4xf32> to vector<4x4xf32>
    %67 = vector.extract_strided_slice %17 {offsets = [0, 0], sizes = [4, 1], strides = [1, 1]} : vector<8x1xf32> to vector<4x1xf32>
    %68 = vector.broadcast %67 : vector<4x1xf32> to vector<4x4xf32>
    %69 = arith.mulf %66, %68 : vector<4x4xf32>
    %cst_29 = arith.constant dense<0.000000e+00> : vector<4xf32>
    %70 = vector.multi_reduction <add>, %69, %cst_29 [0] : vector<4x4xf32> to vector<4xf32>
    %71 = vector.shape_cast %70 : vector<4xf32> to vector<1x4xf32>
    %72 = arith.addf %64, %71 : vector<1x4xf32>
    %c1 = arith.constant 1 : index
    %c0_30 = arith.constant 0 : index
    %c0_31 = arith.constant 0 : index
    %73 = vector.load %arg4[%c1, %c0_30, %c0_31] : memref<4x4x4xf32, #tpu.memory_space<vmem>>, vector<1x4x4xf32>
    %74 = vector.shape_cast %73 : vector<1x4x4xf32> to vector<4x4xf32>
    %75 = vector.extract_strided_slice %31 {offsets = [0, 0], sizes = [4, 1], strides = [1, 1]} : vector<8x1xf32> to vector<4x1xf32>
    %76 = vector.broadcast %75 : vector<4x1xf32> to vector<4x4xf32>
    %77 = arith.mulf %74, %76 : vector<4x4xf32>
    %cst_32 = arith.constant dense<0.000000e+00> : vector<4xf32>
    %78 = vector.multi_reduction <add>, %77, %cst_32 [0] : vector<4x4xf32> to vector<4xf32>
    %79 = vector.shape_cast %78 : vector<4xf32> to vector<1x4xf32>
    %80 = arith.addf %72, %79 : vector<1x4xf32>
    %c2 = arith.constant 2 : index
    %c0_33 = arith.constant 0 : index
    %c0_34 = arith.constant 0 : index
    %81 = vector.load %arg4[%c2, %c0_33, %c0_34] : memref<4x4x4xf32, #tpu.memory_space<vmem>>, vector<1x4x4xf32>
    %82 = vector.shape_cast %81 : vector<1x4x4xf32> to vector<4x4xf32>
    %83 = vector.extract_strided_slice %45 {offsets = [0, 0], sizes = [4, 1], strides = [1, 1]} : vector<8x1xf32> to vector<4x1xf32>
    %84 = vector.broadcast %83 : vector<4x1xf32> to vector<4x4xf32>
    %85 = arith.mulf %82, %84 : vector<4x4xf32>
    %cst_35 = arith.constant dense<0.000000e+00> : vector<4xf32>
    %86 = vector.multi_reduction <add>, %85, %cst_35 [0] : vector<4x4xf32> to vector<4xf32>
    %87 = vector.shape_cast %86 : vector<4xf32> to vector<1x4xf32>
    %88 = arith.addf %80, %87 : vector<1x4xf32>
    %c3 = arith.constant 3 : index
    %c0_36 = arith.constant 0 : index
    %c0_37 = arith.constant 0 : index
    %89 = vector.load %arg4[%c3, %c0_36, %c0_37] : memref<4x4x4xf32, #tpu.memory_space<vmem>>, vector<1x4x4xf32>
    %90 = vector.shape_cast %89 : vector<1x4x4xf32> to vector<4x4xf32>
    %91 = vector.extract_strided_slice %59 {offsets = [0, 0], sizes = [4, 1], strides = [1, 1]} : vector<8x1xf32> to vector<4x1xf32>
    %92 = vector.broadcast %91 : vector<4x1xf32> to vector<4x4xf32>
    %93 = arith.mulf %90, %92 : vector<4x4xf32>
    %cst_38 = arith.constant dense<0.000000e+00> : vector<4xf32>
    %94 = vector.multi_reduction <add>, %93, %cst_38 [0] : vector<4x4xf32> to vector<4xf32>
    %95 = vector.shape_cast %94 : vector<4xf32> to vector<1x4xf32>
    %96 = arith.addf %88, %95 : vector<1x4xf32>
    %97 = arith.mulf %96, %60 : vector<1x4xf32>
    %98 = arith.addf %97, %61 : vector<1x4xf32>
    %99 = arith.negf %98 : vector<1x4xf32>
    %100 = math.exp %99 : vector<1x4xf32>
    %cst_39 = arith.constant 1.000000e+00 : f32
    %101 = vector.broadcast %cst_39 : f32 to vector<1x4xf32>
    %102 = arith.addf %101, %100 : vector<1x4xf32>
    %103 = arith.divf %101, %102 : vector<1x4xf32>
    %104 = arith.mulf %98, %103 : vector<1x4xf32>
    %105 = vector.broadcast %104 : vector<1x4xf32> to vector<4x4xf32>
    %106 = arith.mulf %62, %105 : vector<4x4xf32>
    %cst_40 = arith.constant dense<0.000000e+00> : vector<4xf32>
    %107 = vector.multi_reduction <add>, %106, %cst_40 [1] : vector<4x4xf32> to vector<4xf32>
    %108 = vector.shape_cast %107 : vector<4xf32> to vector<4x1xf32>
    %109 = arith.addf %108, %63 : vector<4x1xf32>
    %110 = arith.negf %109 : vector<4x1xf32>
    %111 = math.exp %110 : vector<4x1xf32>
    %cst_41 = arith.constant 1.000000e+00 : f32
    %112 = vector.broadcast %cst_41 : f32 to vector<4x1xf32>
    %113 = arith.addf %112, %111 : vector<4x1xf32>
    %114 = arith.divf %112, %113 : vector<4x1xf32>
    %cst_42 = arith.constant 1.000000e+00 : f32
    %115 = vector.broadcast %cst_42 : f32 to vector<4x1xf32>
    %116 = arith.addf %114, %115 : vector<4x1xf32>
    %cst_43 = arith.constant 0.000000e+00 : f32
    %117 = vector.broadcast %cst_43 : f32 to vector<1x4xf32>
    %c0_44 = arith.constant 0 : index
    %c0_45 = arith.constant 0 : index
    %c0_46 = arith.constant 0 : index
    %118 = vector.load %arg4[%c0_44, %c0_45, %c0_46] : memref<4x4x4xf32, #tpu.memory_space<vmem>>, vector<1x4x4xf32>
    %119 = vector.shape_cast %118 : vector<1x4x4xf32> to vector<4x4xf32>
    %120 = vector.extract_strided_slice %17 {offsets = [4, 0], sizes = [4, 1], strides = [1, 1]} : vector<8x1xf32> to vector<4x1xf32>
    %121 = vector.broadcast %120 : vector<4x1xf32> to vector<4x4xf32>
    %122 = arith.mulf %119, %121 : vector<4x4xf32>
    %cst_47 = arith.constant dense<0.000000e+00> : vector<4xf32>
    %123 = vector.multi_reduction <add>, %122, %cst_47 [0] : vector<4x4xf32> to vector<4xf32>
    %124 = vector.shape_cast %123 : vector<4xf32> to vector<1x4xf32>
    %125 = arith.addf %117, %124 : vector<1x4xf32>
    %c1_48 = arith.constant 1 : index
    %c0_49 = arith.constant 0 : index
    %c0_50 = arith.constant 0 : index
    %126 = vector.load %arg4[%c1_48, %c0_49, %c0_50] : memref<4x4x4xf32, #tpu.memory_space<vmem>>, vector<1x4x4xf32>
    %127 = vector.shape_cast %126 : vector<1x4x4xf32> to vector<4x4xf32>
    %128 = vector.extract_strided_slice %31 {offsets = [4, 0], sizes = [4, 1], strides = [1, 1]} : vector<8x1xf32> to vector<4x1xf32>
    %129 = vector.broadcast %128 : vector<4x1xf32> to vector<4x4xf32>
    %130 = arith.mulf %127, %129 : vector<4x4xf32>
    %cst_51 = arith.constant dense<0.000000e+00> : vector<4xf32>
    %131 = vector.multi_reduction <add>, %130, %cst_51 [0] : vector<4x4xf32> to vector<4xf32>
    %132 = vector.shape_cast %131 : vector<4xf32> to vector<1x4xf32>
    %133 = arith.addf %125, %132 : vector<1x4xf32>
    %c2_52 = arith.constant 2 : index
    %c0_53 = arith.constant 0 : index
    %c0_54 = arith.constant 0 : index
    %134 = vector.load %arg4[%c2_52, %c0_53, %c0_54] : memref<4x4x4xf32, #tpu.memory_space<vmem>>, vector<1x4x4xf32>
    %135 = vector.shape_cast %134 : vector<1x4x4xf32> to vector<4x4xf32>
    %136 = vector.extract_strided_slice %45 {offsets = [4, 0], sizes = [4, 1], strides = [1, 1]} : vector<8x1xf32> to vector<4x1xf32>
    %137 = vector.broadcast %136 : vector<4x1xf32> to vector<4x4xf32>
    %138 = arith.mulf %135, %137 : vector<4x4xf32>
    %cst_55 = arith.constant dense<0.000000e+00> : vector<4xf32>
    %139 = vector.multi_reduction <add>, %138, %cst_55 [0] : vector<4x4xf32> to vector<4xf32>
    %140 = vector.shape_cast %139 : vector<4xf32> to vector<1x4xf32>
    %141 = arith.addf %133, %140 : vector<1x4xf32>
    %c3_56 = arith.constant 3 : index
    %c0_57 = arith.constant 0 : index
    %c0_58 = arith.constant 0 : index
    %142 = vector.load %arg4[%c3_56, %c0_57, %c0_58] : memref<4x4x4xf32, #tpu.memory_space<vmem>>, vector<1x4x4xf32>
    %143 = vector.shape_cast %142 : vector<1x4x4xf32> to vector<4x4xf32>
    %144 = vector.extract_strided_slice %59 {offsets = [4, 0], sizes = [4, 1], strides = [1, 1]} : vector<8x1xf32> to vector<4x1xf32>
    %145 = vector.broadcast %144 : vector<4x1xf32> to vector<4x4xf32>
    %146 = arith.mulf %143, %145 : vector<4x4xf32>
    %cst_59 = arith.constant dense<0.000000e+00> : vector<4xf32>
    %147 = vector.multi_reduction <add>, %146, %cst_59 [0] : vector<4x4xf32> to vector<4xf32>
    %148 = vector.shape_cast %147 : vector<4xf32> to vector<1x4xf32>
    %149 = arith.addf %141, %148 : vector<1x4xf32>
    %150 = arith.mulf %149, %60 : vector<1x4xf32>
    %151 = arith.addf %150, %61 : vector<1x4xf32>
    %152 = arith.negf %151 : vector<1x4xf32>
    %153 = math.exp %152 : vector<1x4xf32>
    %cst_60 = arith.constant 1.000000e+00 : f32
    %154 = vector.broadcast %cst_60 : f32 to vector<1x4xf32>
    %155 = arith.addf %154, %153 : vector<1x4xf32>
    %156 = arith.divf %154, %155 : vector<1x4xf32>
    %157 = arith.mulf %151, %156 : vector<1x4xf32>
    %158 = vector.broadcast %157 : vector<1x4xf32> to vector<4x4xf32>
    %159 = arith.mulf %62, %158 : vector<4x4xf32>
    %cst_61 = arith.constant dense<0.000000e+00> : vector<4xf32>
    %160 = vector.multi_reduction <add>, %159, %cst_61 [1] : vector<4x4xf32> to vector<4xf32>
    %161 = vector.shape_cast %160 : vector<4xf32> to vector<4x1xf32>
    %162 = arith.addf %161, %63 : vector<4x1xf32>
    %163 = arith.negf %162 : vector<4x1xf32>
    %164 = math.exp %163 : vector<4x1xf32>
    %cst_62 = arith.constant 1.000000e+00 : f32
    %165 = vector.broadcast %cst_62 : f32 to vector<4x1xf32>
    %166 = arith.addf %165, %164 : vector<4x1xf32>
    %167 = arith.divf %165, %166 : vector<4x1xf32>
    %cst_63 = arith.constant 1.000000e+00 : f32
    %168 = vector.broadcast %cst_63 : f32 to vector<4x1xf32>
    %169 = arith.addf %167, %168 : vector<4x1xf32>
    %170 = tpu.concatenate %116, %169 in 0 : vector<4x1xf32>, vector<4x1xf32> -> vector<8x1xf32>
    %171 = vector.broadcast %170 : vector<8x1xf32> to vector<8x256xf32>
    %172 = arith.mulf %1, %171 : vector<8x256xf32>
    %c0_64 = arith.constant 0 : index
    %c0_65 = arith.constant 0 : index
    %c0_66 = arith.constant 0 : index
    %173 = vector.load %arg9[%c0_64, %c0_65, %c0_66] : memref<1x8x256xf32, #tpu.memory_space<vmem>>, vector<1x8x256xf32>
    %174 = vector.shape_cast %173 : vector<1x8x256xf32> to vector<8x256xf32>
    %175 = vector.shape_cast %172 : vector<8x256xf32> to vector<1x8x256xf32>
    tpu.vector_store %arg9[%c0_64, %c0_65, %c0_66], %175 {strides = array<i32>} : memref<1x8x256xf32, #tpu.memory_space<vmem>>, vector<1x8x256xf32>,
    return
  }
  func.func @transform_0(%arg0: i32) -> (i32, i32, i32) {
    %c0_i32 = arith.constant 0 : i32
    %c0_i32_0 = arith.constant 0 : i32
    %c0_i32_1 = arith.constant 0 : i32
    return %arg0, %c0_i32, %c0_i32_0 : i32, i32, i32
  }
  func.func @transform_1(%arg0: i32) -> (i32, i32) {
    %c0_i32 = arith.constant 0 : i32
    %c0_i32_0 = arith.constant 0 : i32
    %c0_i32_1 = arith.constant 0 : i32
    return %c0_i32, %c0_i32_0 : i32, i32
  }
  func.func @transform_2(%arg0: i32) -> (i32, i32) {
    %c0_i32 = arith.constant 0 : i32
    %c0_i32_0 = arith.constant 0 : i32
    %c0_i32_1 = arith.constant 0 : i32
    return %c0_i32, %c0_i32_0 : i32, i32
  }
  func.func @transform_3(%arg0: i32) -> (i32, i32, i32) {
    %c0_i32 = arith.constant 0 : i32
    %c0_i32_0 = arith.constant 0 : i32
    %c0_i32_1 = arith.constant 0 : i32
    %c0_i32_2 = arith.constant 0 : i32
    return %c0_i32, %c0_i32_0, %c0_i32_1 : i32, i32, i32
  }
  func.func @transform_4(%arg0: i32) -> (i32, i32) {
    %c0_i32 = arith.constant 0 : i32
    %c0_i32_0 = arith.constant 0 : i32
    %c0_i32_1 = arith.constant 0 : i32
    return %c0_i32, %c0_i32_0 : i32, i32
  }
  func.func @transform_5(%arg0: i32) -> (i32, i32) {
    %c0_i32 = arith.constant 0 : i32
    %c0_i32_0 = arith.constant 0 : i32
    %c0_i32_1 = arith.constant 0 : i32
    return %c0_i32, %c0_i32_0 : i32, i32
  }
  func.func @transform_6(%arg0: i32) -> (i32, i32) {
    %c0_i32 = arith.constant 0 : i32
    %c0_i32_0 = arith.constant 0 : i32
    %c0_i32_1 = arith.constant 0 : i32
    return %c0_i32, %c0_i32_0 : i32, i32
  }
  func.func @transform_7(%arg0: i32) -> (i32, i32) {
    %c0_i32 = arith.constant 0 : i32
    %c0_i32_0 = arith.constant 0 : i32
    %c0_i32_1 = arith.constant 0 : i32
    return %c0_i32, %c0_i32_0 : i32, i32
  }
  func.func @transform_8(%arg0: i32) -> (i32, i32, i32) {
    %c0_i32 = arith.constant 0 : i32
    %c0_i32_0 = arith.constant 0 : i32
    %c0_i32_1 = arith.constant 0 : i32
    return %arg0, %c0_i32, %c0_i32_0 : i32, i32, i32
  }
}

</mosaic_0001>

<bundles_post_ra>
// kernel: tpu_custom_call.1
= control target key start
LH: loop header
LB: loop body
LE: loop exit
PB: predicated region body
PF: predicated region fallthrough
CT: control target
= control target key end

     0   :  { %13 = vsyncpa [#allocation3], 0  ;;  %s584_s0 = inlined_call_operand.vmem [shape: f32[1,8,256], index: 0, kind: input, shape index: {}]   ;;  %s585_s1 = inlined_call_operand.vmem [shape: f32[8,4], index: 1, kind: input, shape index: {}]   ;;  %s586_s2 = inlined_call_operand.vmem [shape: f32[8,4], index: 2, kind: input, shape index: {}]   ;;  %s587_s3 = inlined_call_operand.hbm [shape: f32[4,4,4], index: 3, kind: input, shape index: {}]   ;;  %s588_s4 = inlined_call_operand.vmem [shape: f32[1,4], index: 4, kind: input, shape index: {}]   ;;  %s589_s5 = inlined_call_operand.vmem [shape: f32[1,4], index: 5, kind: input, shape index: {}]   ;;  %s590_s6 = inlined_call_operand.vmem [shape: f32[4,4], index: 6, kind: input, shape index: {}]   ;;  %s591_s7 = inlined_call_operand.vmem [shape: f32[4,1], index: 7, kind: input, shape index: {}]   ;;  %s592_s8 = inlined_call_operand.hbm [shape: f32[1,8,256], index: 8, kind: output, shape index: {}]  }
   0x1   :  { %14 = vsyncpa [#allocation4], 0  ;;  %s25_s29 = sshll.u32 %s587_s3, 4  ;;  %s477_s30 = smov [#allocation2]   ;;  %s26_s29 = int_to_ptr.hbm [resolvable:$true] %s25_s29 }
   0x2   :  { %s27_s9 = sshll.u32 %s477_s30, 4  ;;  %s478_s10 = smov 64   ;;  %s28_s9 = int_to_ptr.vmem [resolvable:$true] %s27_s9 }
   0x3   :  { %s479_s11 = smov 4  }
   0x4   :  { %33 = dma.hbm_to_vmem [thread:$0]  %s26_s29, 256, %s28_s9, [#allocation3], %s478_s10, %s478_s10, %s479_s11  }
   0x5   :  { %473 = dma.done.wait [#allocation3], 256  }
   0x6   :  { %474 = vsyncadd [#allocation3], 4294967040  ;;  %v480_v0 = vmov 2   ;;  %v481_v1 = vmov 0   ;;  %v48_v2 = vld [vmem:[%s585_s1] sm:$0xff]  ;;  %v482_v4 = vmov 3  }
   0x7   :  { %385 = vset.pattern.permute.xlu1 %v480_v0  ;;  %383 = vset.pattern.permute.xlu0 %v481_v1  ;;  %v49_v3 = vld [vmem:[%s586_s2] sm:$0xff]  ;;  %v483_v5 = vmov 1   ;;  %v547_v8 = vld [vmem:[%s584_s0 + $0x8] sm:$0xff]  ;;  %vm154_vm0 = vcmask 27648   ;;  %s361_s24 = sshll.u32 %s592_s8, 4  ;;  %s362_s24 = int_to_ptr.hbm [resolvable:$true] %s361_s24 }
   0x8   :  { %387 = vset.pattern.permute.xlu2 %v481_v1  ;;  %101 = vperm.xlu1 %385, %v48_v2   ;;  %v542_v7 = vld [vmem:[%s584_s0] sm:$0xff] }
   0x9   :  { %52 = vperm.xlu0 %383, %v48_v2   ;;  %63 = vperm.xlu2 %387, %v49_v3  }
  0x10   :  { %386 = vset.pattern.permute.xlu1 %v482_v4 }
  0x11   :  { %384 = vset.pattern.permute.xlu0 %v483_v5  ;;  %125 = vperm.xlu1 %386, %v48_v2  }
  0x12   :  { %77 = vperm.xlu0 %384, %v48_v2   ;;  %388 = vset.pattern.permute.xlu2 %v483_v5 }
  0x13   :  { %87 = vperm.xlu2 %388, %v49_v3  }
  0x19   :  { %389 = vset.pattern.permute.xlu1 %v480_v0 }
  0x1a   :  { %392 = vset.pattern.permute.xlu0 %v481_v1  ;;  %111 = vperm.xlu1 %389, %v49_v3  }
  0x1b   :  { %390 = vset.pattern.permute.xlu2 %v482_v4  ;;  %v152_v4 = vld [vmem:[#allocation2] sm:$0xf] }
  0x1c   :  { %135 = vperm.xlu2 %390, %v49_v3  }
  0x24   :  { %391 = vset.pattern.permute.xlu2 %v481_v1 }
  0x63   :  { %v64_v6 = vpop.permute.xlu2 %63 }
  0x6d   :  { %v88_v19 = vpop.permute.xlu2 %87 }
  0x76   :  { %v136_v49 = vpop.permute.xlu2 %135 }
  0x7a   :  { %v102_v9 = vpop.permute.xlu1 %101 }
  0x7b   :  { %v53_v10 = vpop.permute.xlu0 %52  ;;  %v104_v20 = vsub.f32 %v542_v7, %v102_v9  ;;  %v105_v21 = vsub.f32 %v547_v8, %v102_v9 }
  0x7c   :  { %v55_v11 = vsub.f32 %v542_v7, %v53_v10  ;;  %v56_v12 = vsub.f32 %v547_v8, %v53_v10 }
  0x7d   :  { %v106_v31 = vmul.f32 %v104_v20, %v104_v20  ;;  %v107_v32 = vmul.f32 %v105_v21, %v105_v21 }
  0x7e   :  { %v57_v13 = vmul.f32 %v55_v11, %v55_v11  ;;  %v58_v14 = vmul.f32 %v56_v12, %v56_v12 }
  0x7f   :  { %v108_v40 = vsub.f32 0.0, %v106_v31  ;;  %v109_v41 = vsub.f32 0.0, %v107_v32 }
  0x80   :  { %v59_v15 = vsub.f32 0.0, %v57_v13  ;;  %v60_v16 = vsub.f32 0.0, %v58_v14 }
  0x82   :  { %v66_v17 = vmul.f32 %v64_v6, %v59_v15  ;;  %v67_v18 = vmul.f32 %v64_v6, %v60_v16  ;;  %v164_v15 = vld [vmem:[#allocation2 + $0x4] sm:$0xf] }
  0x83   :  { %v126_v24 = vpop.permute.xlu1 %125 }
  0x84   :  { %v68_v22 = vmul.f32 1.442695, %v66_v17  ;;  %v70_v23 = vmul.f32 1.442695, %v67_v18  ;;  %v78_v25 = vpop.permute.xlu0 %77  ;;  %v128_v26 = vsub.f32 %v542_v7, %v126_v24  ;;  %v129_v27 = vsub.f32 %v547_v8, %v126_v24 }
  0x85   :  { %v80_v28 = vsub.f32 %v542_v7, %v78_v25  ;;  %v81_v29 = vsub.f32 %v547_v8, %v78_v25 }
  0x86   :  { %393 = vpow2.f32 %v68_v22  ;;  %v130_v34 = vmul.f32 %v128_v26, %v128_v26  ;;  %v131_v35 = vmul.f32 %v129_v27, %v129_v27  ;;  %v175_v26 = vld [vmem:[#allocation2 + $0x8] sm:$0xf] }
  0x87   :  { %395 = vpow2.f32 %v70_v23  ;;  %v82_v30 = vmul.f32 %v80_v28, %v80_v28  ;;  %v83_v33 = vmul.f32 %v81_v29, %v81_v29 }
  0x88   :  { %v132_v44 = vsub.f32 0.0, %v130_v34  ;;  %v133_v45 = vsub.f32 0.0, %v131_v35 }
  0x89   :  { %v84_v36 = vsub.f32 0.0, %v82_v30  ;;  %v85_v37 = vsub.f32 0.0, %v83_v33 }
  0x8a   :  { %v138_v55 = vmul.f32 %v136_v49, %v132_v44  ;;  %v139_v56 = vmul.f32 %v136_v49, %v133_v45  ;;  %v186_v45 = vld [vmem:[#allocation2 + $0xc] sm:$0xf] }
  0x8b   :  { %v90_v38 = vmul.f32 %v88_v19, %v84_v36  ;;  %v91_v42 = vmul.f32 %v88_v19, %v85_v37 }
  0x8c   :  { %v394_v39 = vpop.eup %393  ;;  %v112_v47 = vpop.permute.xlu1 %111  ;;  %v140_v58 = vmul.f32 1.442695, %v138_v55  ;;  %v142_v60 = vmul.f32 1.442695, %v139_v56 }
  0x8d   :  { %v396_v43 = vpop.eup %395  ;;  %v92_v46 = vmul.f32 1.442695, %v90_v38  ;;  %v94_v48 = vmul.f32 1.442695, %v91_v42  ;;  %v114_v50 = vmul.f32 %v112_v47, %v108_v40  ;;  %v115_v51 = vmul.f32 %v112_v47, %v109_v41 }
  0x8e   :  { %v72_v52 = vadd.f32 %v396_v43, %v394_v39 }
  0x8f   :  { %397 = vpow2.f32 %v92_v46  ;;  %v116_v53 = vmul.f32 1.442695, %v114_v50  ;;  %v118_v54 = vmul.f32 1.442695, %v115_v51 }
  0x90   :  { %399 = vpow2.f32 %v94_v48  ;;  %73 = vadd.xlane.f32.xlu0 %v72_v52 }
  0x91   :  { %401 = vpow2.f32 %v116_v53 }
  0x92   :  { %403 = vpow2.f32 %v118_v54 }
  0x93   :  { %405 = vpow2.f32 %v140_v58 }
  0x94   :  { %407 = vpow2.f32 %v142_v60 }
  0x95   :  { %v398_v57 = vpop.eup %397 }
  0x96   :  { %v400_v59 = vpop.eup %399 }
  0x97   :  { %v96_v61 = vadd.f32 %v400_v59, %v398_v57  ;;  %v402_v62 = vpop.eup %401 }
  0x98   :  { %v404_v63 = vpop.eup %403 }
  0x99   :  { %97 = vadd.xlane.f32.xlu1 %v96_v61  ;;  %v120_v0 = vadd.f32 %v404_v63, %v402_v62  ;;  %v406_v1 = vpop.eup %405 }
  0x9a   :  { %v408_v2 = vpop.eup %407 }
  0x9b   :  { %121 = vadd.xlane.f32.xlu2 %v120_v0  ;;  %v144_v3 = vadd.f32 %v408_v2, %v406_v1 }
  0xa3   :  { %145 = vadd.xlane.f32.xlu2 %v144_v3 }
 0x103   :  { %v74_v5 = vpop.xlane.xlu0 %73 }
 0x104   :  { %v75_v6 = vmul.f32 0.00390625, %v74_v5 }
 0x106   :  { %v153_v9 = vmul.f32 %v152_v4, %v75_v6  ;;  %v245_v10 = vrot.slane %v75_v6, 4 }
 0x108   :  { %v155_v11 = vsel %vm154_vm0, %v153_v9, 0.0  ;;  %v247_v12 = vmul.f32 %v245_v10, %v152_v4 }
 0x109   :  { %v156_v14 = vrot.slane %v155_v11, 4 }
 0x10a   :  { %v248_v13 = vsel %vm154_vm0, %v247_v12, 0.0 }
 0x10b   :  { %v249_v17 = vrot.slane %v248_v13, 4  ;;  %v157_v19 = vadd.f32 %v156_v14, %v155_v11 }
 0x10c   :  { %v98_v16 = vpop.xlane.xlu1 %97 }
 0x10d   :  { %v99_v18 = vmul.f32 0.00390625, %v98_v16  ;;  %v250_v23 = vadd.f32 %v249_v17, %v248_v13  ;;  %v158_v29 = vrot.slane %v157_v19, 2 }
 0x10e   :  { %v122_v22 = vpop.xlane.xlu2 %121 }
 0x10f   :  { %v165_v20 = vmul.f32 %v164_v15, %v99_v18  ;;  %v257_v21 = vrot.slane %v99_v18, 4  ;;  %v123_v28 = vmul.f32 0.00390625, %v122_v22  ;;  %v251_v35 = vrot.slane %v250_v23, 2 }
 0x110   :  { %v159_v41 = vadd.f32 %v158_v29, %v157_v19 }
 0x111   :  { %v166_v24 = vsel %vm154_vm0, %v165_v20, 0.0  ;;  %v259_v25 = vmul.f32 %v257_v21, %v164_v15  ;;  %v176_v33 = vmul.f32 %v175_v26, %v123_v28  ;;  %v269_v34 = vrot.slane %v123_v28, 4 }
 0x112   :  { %v167_v27 = vrot.slane %v166_v24, 4  ;;  %v252_v50 = vadd.f32 %v251_v35, %v250_v23  ;;  %v160_v56 = vrot.slane %v159_v41, 1 }
 0x113   :  { %v260_v30 = vsel %vm154_vm0, %v259_v25, 0.0  ;;  %v177_v38 = vsel %vm154_vm0, %v176_v33, 0.0  ;;  %v271_v39 = vmul.f32 %v269_v34, %v175_v26  ;;  %v148_v26 = vld [vmem:[%s588_s4] sm:$0x1] }
 0x114   :  { %v168_v31 = vadd.f32 %v167_v27, %v166_v24  ;;  %v261_v32 = vrot.slane %v260_v30, 4  ;;  %v178_v40 = vrot.slane %v177_v38, 4  ;;  %v253_v0 = vrot.slane %v252_v50, 1 }
 0x115   :  { %v272_v44 = vsel %vm154_vm0, %v271_v39, 0.0  ;;  %v161_v9 = vadd.f32 %v160_v56, %v159_v41 }
 0x116   :  { %v169_v36 = vrot.slane %v168_v31, 2  ;;  %v262_v37 = vadd.f32 %v261_v32, %v260_v30  ;;  %v146_v46 = vpop.xlane.xlu2 %145  ;;  %v179_v47 = vadd.f32 %v178_v40, %v177_v38  ;;  %v273_v48 = vrot.slane %v272_v44, 4  ;;  %v149_v30 = vld [vmem:[%s589_s5] sm:$0x1] }
 0x117   :  { %v147_v49 = vmul.f32 0.00390625, %v146_v46  ;;  %v254_v14 = vadd.f32 %v253_v0, %v252_v50 }
 0x118   :  { %v170_v42 = vadd.f32 %v169_v36, %v168_v31  ;;  %v263_v43 = vrot.slane %v262_v37, 2  ;;  %v180_v52 = vrot.slane %v179_v47, 2  ;;  %v274_v53 = vadd.f32 %v273_v48, %v272_v44 }
 0x119   :  { %v187_v54 = vmul.f32 %v186_v45, %v147_v49  ;;  %v281_v55 = vrot.slane %v147_v49, 4 }
 0x11a   :  { %v264_v51 = vadd.f32 %v263_v43, %v262_v37  ;;  %v171_v57 = vrot.slane %v170_v42, 1  ;;  %v181_v58 = vadd.f32 %v180_v52, %v179_v47  ;;  %v275_v59 = vrot.slane %v274_v53, 2 }
 0x11b   :  { %v188_v60 = vsel %vm154_vm0, %v187_v54, 0.0  ;;  %v283_v61 = vmul.f32 %v281_v55, %v186_v45 }
 0x11c   :  { %v265_v62 = vrot.slane %v264_v51, 1  ;;  %v189_v63 = vrot.slane %v188_v60, 4  ;;  %v276_v1 = vadd.f32 %v275_v59, %v274_v53  ;;  %v172_v3 = vadd.f32 %v171_v57, %v170_v42 }
 0x11d   :  { %v284_v2 = vsel %vm154_vm0, %v283_v61, 0.0  ;;  %v182_v4 = vrot.slane %v181_v58, 1  ;;  %v150_v61 = vld [vmem:[%s590_s6] sm:$0xf]  ;;  %s484_s6 = smov [#allocation5]  }
 0x11e   :  { %v190_v5 = vadd.f32 %v189_v63, %v188_v60  ;;  %v285_v6 = vrot.slane %v284_v2, 4  ;;  %v266_v10 = vadd.f32 %v265_v62, %v264_v51  ;;  %v277_v11 = vrot.slane %v276_v1, 1 }
 0x11f   :  { %v173_v15 = vadd.f32 %v172_v3, %v161_v9  ;;  %v183_v16 = vadd.f32 %v182_v4, %v181_v58  ;;  %v151_v9 = vld [vmem:[%s591_s7] sm:$0xf]  ;;  %s359_s7 = sshll.u32 %s484_s6, 4  ;;  %s360_s7 = int_to_ptr.vmem [resolvable:$true] %s359_s7 }
 0x120   :  { %v191_v12 = vrot.slane %v190_v5, 2  ;;  %v286_v13 = vadd.f32 %v285_v6, %v284_v2  ;;  %v267_v19 = vadd.f32 %v266_v10, %v254_v14  ;;  %v278_v20 = vadd.f32 %v277_v11, %v276_v1 }
 0x121   :  { %v184_v23 = vadd.f32 %v183_v16, %v173_v15 }
 0x122   :  { %v192_v17 = vadd.f32 %v191_v12, %v190_v5  ;;  %v287_v18 = vrot.slane %v286_v13, 2  ;;  %v279_v29 = vadd.f32 %v278_v20, %v267_v19 }
 0x124   :  { %v193_v21 = vrot.slane %v192_v17, 1  ;;  %v288_v22 = vadd.f32 %v287_v18, %v286_v13 }
 0x126   :  { %v194_v24 = vadd.f32 %v193_v21, %v192_v17  ;;  %v289_v25 = vrot.slane %v288_v22, 1 }
 0x128   :  { %v290_v27 = vadd.f32 %v289_v25, %v288_v22  ;;  %v195_v28 = vadd.f32 %v194_v24, %v184_v23 }
 0x12a   :  { %v196_v31 = vmul.f32 %v195_v28, %v148_v26  ;;  %v291_v32 = vadd.f32 %v290_v27, %v279_v29 }
 0x12c   :  { %v197_v33 = vadd.f32 %v196_v31, %v149_v30  ;;  %v292_v34 = vmul.f32 %v291_v32, %v148_v26 }
 0x12e   :  { %v371_v35 = vmul.f32 -1.442695, %v197_v33  ;;  %v293_v36 = vadd.f32 %v292_v34, %v149_v30 }
 0x130   :  { %409 = vpow2.f32 %v371_v35  ;;  %v373_v37 = vmul.f32 -1.442695, %v293_v36 }
 0x132   :  { %411 = vpow2.f32 %v373_v37 }
 0x136   :  { %v410_v38 = vpop.eup %409 }
 0x137   :  { %v201_v39 = vadd.f32 1.0, %v410_v38 }
 0x138   :  { %v412_v40 = vpop.eup %411 }
 0x139   :  { %413 = vrcp.f32 %v201_v39  ;;  %v297_v41 = vadd.f32 1.0, %v412_v40  ;;  %v213_v46 = vand.u32 2147483648, %v201_v39  ;;  %v211_v49 = vand.u32 2147483647, %v201_v39 }
 0x13a   :  { %vm207_vm2 = vweird.f32 %v201_v39 }
 0x13b   :  { %415 = vrcp.f32 %v297_v41  ;;  %v309_v52 = vand.u32 2147483648, %v297_v41  ;;  %v214_v53 = vor.u32 1.1754944e-38, %v213_v46  ;;  %v307_v55 = vand.u32 2147483647, %v297_v41 }
 0x13c   :  { %vm212_vm5 = vcmp.eq.f32.partialorder %v211_v49, 8.507059e+37  ;;  %vm303_vm6 = vweird.f32 %v297_v41 }
 0x13d   :  { %v310_v60 = vor.u32 1.1754944e-38, %v309_v52  ;;  %vm308_vm8 = vcmp.eq.f32.partialorder %v307_v55, 8.507059e+37 }
 0x13f   :  { %v414_v42 = vpop.eup %413 }
 0x140   :  { %v203_v43 = vmul.f32 %v414_v42, %v201_v39  ;;  %vm208_vm1 = vweird.f32 %v414_v42 }
 0x141   :  { %v416_v44 = vpop.eup %415  ;;  %vm209_vm3 = vmor %vm207_vm2, %vm208_vm1  ;;  %vm343_vm1 = vcmask 1043456  }
 0x142   :  { %v204_v45 = vsub.f32 1.0, %v203_v43  ;;  %v299_v47 = vmul.f32 %v416_v44, %v297_v41  ;;  %vm304_vm4 = vweird.f32 %v416_v44 }
 0x143   :  { %vm305_vm7 = vmor %vm303_vm6, %vm304_vm4 }
 0x144   :  { %v205_v48 = vmul.f32 %v414_v42, %v204_v45  ;;  %v300_v50 = vsub.f32 1.0, %v299_v47 }
 0x146   :  { %v206_v51 = vadd.f32 %v414_v42, %v205_v48  ;;  %v301_v54 = vmul.f32 %v416_v44, %v300_v50 }
 0x148   :  { %v210_v56 = vsel %vm209_vm3, %v414_v42, %v206_v51  ;;  %v302_v58 = vadd.f32 %v416_v44, %v301_v54 }
 0x149   :  { %v215_v57 = vsel %vm212_vm5, %v214_v53, %v210_v56 }
 0x14a   :  { %v217_v59 = vmul.f32 %v215_v57, %v197_v33  ;;  %v306_v62 = vsel %vm305_vm7, %v416_v44, %v302_v58 }
 0x14b   :  { %v311_v0 = vsel %vm308_vm8, %v310_v60, %v306_v62 }
 0x14c   :  { %v218_v63 = vperm.slane %v217_v59, 0  ;;  %v313_v1 = vmul.f32 %v311_v0, %v293_v36 }
 0x14e   :  { %v219_v2 = vmul.f32 %v218_v63, %v150_v61  ;;  %v314_v3 = vperm.slane %v313_v1, 0 }
 0x150   :  { %v220_v4 = vsel %vm154_vm0, %v219_v2, 0.0  ;;  %v315_v5 = vmul.f32 %v314_v3, %v150_v61 }
 0x151   :  { %221 = vadd.xlane.f32.xlu1 %v220_v4 }
 0x152   :  { %v316_v6 = vsel %vm154_vm0, %v315_v5, 0.0 }
 0x153   :  { %317 = vadd.xlane.f32.xlu0 %v316_v6 }
 0x1c4   :  { %v222_v10 = vpop.xlane.xlu1 %221 }
 0x1c5   :  { %v223_v11 = vadd.f32 %v222_v10, %v151_v9 }
 0x1c6   :  { %v318_v13 = vpop.xlane.xlu0 %317 }
 0x1c7   :  { %v372_v12 = vmul.f32 -1.442695, %v223_v11  ;;  %v319_v14 = vadd.f32 %v318_v13, %v151_v9 }
 0x1c9   :  { %417 = vpow2.f32 %v372_v12  ;;  %v374_v15 = vmul.f32 -1.442695, %v319_v14 }
 0x1cb   :  { %419 = vpow2.f32 %v374_v15 }
 0x1cf   :  { %v418_v16 = vpop.eup %417 }
 0x1d0   :  { %v227_v17 = vadd.f32 1.0, %v418_v16 }
 0x1d1   :  { %v420_v18 = vpop.eup %419 }
 0x1d2   :  { %421 = vrcp.f32 %v227_v17  ;;  %v323_v19 = vadd.f32 1.0, %v420_v18  ;;  %vm233_vm10 = vweird.f32 %v227_v17  ;;  %v239_v28 = vand.u32 2147483648, %v227_v17 }
 0x1d3   :  { %v237_v30 = vand.u32 2147483647, %v227_v17 }
 0x1d4   :  { %423 = vrcp.f32 %v323_v19  ;;  %v335_v29 = vand.u32 2147483648, %v323_v19  ;;  %v333_v32 = vand.u32 2147483647, %v323_v19  ;;  %vm329_vm13 = vweird.f32 %v323_v19 }
 0x1d5   :  { %v240_v35 = vor.u32 1.1754944e-38, %v239_v28  ;;  %vm238_vm15 = vcmp.eq.f32.partialorder %v237_v30, 8.507059e+37 }
 0x1d6   :  { %v336_v36 = vor.u32 1.1754944e-38, %v335_v29  ;;  %vm334_vm0 = vcmp.eq.f32.partialorder %v333_v32, 8.507059e+37 }
 0x1d8   :  { %v422_v20 = vpop.eup %421 }
 0x1d9   :  { %v229_v21 = vmul.f32 %v422_v20, %v227_v17  ;;  %vm234_vm9 = vweird.f32 %v422_v20 }
 0x1da   :  { %v424_v22 = vpop.eup %423  ;;  %vm235_vm12 = vmor %vm233_vm10, %vm234_vm9 }
 0x1db   :  { %v230_v23 = vsub.f32 1.0, %v229_v21  ;;  %v325_v24 = vmul.f32 %v424_v22, %v323_v19  ;;  %vm330_vm11 = vweird.f32 %v424_v22 }
 0x1dc   :  { %vm331_vm14 = vmor %vm329_vm13, %vm330_vm11 }
 0x1dd   :  { %v231_v25 = vmul.f32 %v422_v20, %v230_v23  ;;  %v326_v26 = vsub.f32 1.0, %v325_v24 }
 0x1df   :  { %v232_v27 = vadd.f32 %v422_v20, %v231_v25  ;;  %v327_v31 = vmul.f32 %v424_v22, %v326_v26 }
 0x1e1   :  { %v236_v33 = vsel %vm235_vm12, %v422_v20, %v232_v27  ;;  %v328_v34 = vadd.f32 %v424_v22, %v327_v31 }
 0x1e2   :  { %v241_v38 = vsel %vm238_vm15, %v240_v35, %v236_v33 }
 0x1e3   :  { %v332_v37 = vsel %vm331_vm14, %v424_v22, %v328_v34  ;;  %v243_v41 = vadd.f32 1.0, %v241_v38 }
 0x1e4   :  { %v337_v39 = vsel %vm334_vm0, %v336_v36, %v332_v37 }
 0x1e5   :  { %v339_v40 = vadd.f32 1.0, %v337_v39 }
 0x1e7   :  { %v341_v42 = vrot.slane %v339_v40, 4 }
 0x1e9   :  { %v344_v43 = vsel %vm343_vm1, %v243_v41, %v341_v42 }
 0x1ea   :  { %347 = vperm.xlu2 %391, %v344_v43  }
 0x244   :  { %v348_v44 = vpop.permute.xlu2 %347 }
 0x245   :  { %v350_v45 = vmul.f32 %v348_v44, %v542_v7  ;;  %v351_v46 = vmul.f32 %v348_v44, %v547_v8 }
 0x247   :  { %352 = vst [vmem:[#allocation5] sm:$0xff] %v350_v45 }
 0x248   :  { %353 = vst [vmem:[#allocation5 + $0x8] sm:$0xff] %v351_v46 }
 0x249   :  { %364 = dma.vmem_to_hbm [thread:$0]  %s360_s7, 256, %s362_s24, [#allocation4]  }
 0x24a   :  { %475 = dma.done.wait [#allocation4], 256  }
 0x24b   :  { %476 = vsyncadd [#allocation4], 4294967040 }
 0x24c   :  { %369 = vsyncpa [#allocation3], 1 }
 0x24d   :  { %370 = vsyncpa [#allocation4], 1 }

</bundles_post_ra>
